<compile_context>
chip_gen: v5e
topology: v5e:2x2
jax: 0.10.0
libtpu: 0.0.40
codegen_flags: <defaults>
</compile_context>

<pallas_src>
import functools

import jax
import jax.numpy as jnp
from jax import lax
from jax.experimental import pallas as pl
from jax.experimental.pallas import tpu as pltpu

BN_EPS = 1e-5


# ------------------------------- fused kernel ------------------------------- #

def _make_fused_kernel(H, W, nin, nout, has_proj, compute_dtype):
    HW = H * W
    PAD = W + 1                      # flat halo (covers +/- one image row + one col)
    cd = compute_dtype

    def kernel(*refs):
        if has_proj:
            (x_ref, w1_ref, b1_ref, a_ref, w2_ref, b2_ref, wr_ref, br_ref,
             o_ref, xpad_ref, y1pad_ref, xcol_ref, ycol_ref) = refs
        else:
            (x_ref, w1_ref, b1_ref, a_ref, w2_ref, b2_ref,
             o_ref, xpad_ref, y1pad_ref, xcol_ref, ycol_ref) = refs
            wr_ref = br_ref = None

        # Horizontal-wrap masks for the flat row-major HW axis: a tap with dw=0
        # (dw=2) must not contribute at output columns with w == 0 (w == W-1);
        # the vertical boundary is handled by the zero halo.
        wpos = lax.broadcasted_iota(jnp.int32, (1, HW), 1) % W
        m_left = (wpos != 0).astype(cd)
        m_right = (wpos != W - 1).astype(cd)

        def build_im2col(pad_ref, col_ref, src, C, m_l, m_r):
            # Zero ONLY the halo lanes every step (scratch persists across steps;
            # a one-time init would break under megacore batch sharding).
            pad_ref[:, pl.ds(0, PAD)] = jnp.zeros((C, PAD), cd)
            pad_ref[:, pl.ds(PAD + HW, PAD)] = jnp.zeros((C, PAD), cd)
            pad_ref[:, pl.ds(PAD, HW)] = src
            for k in range(9):                      # 9 lane-shifted slices, no reshape
                dh, dw = k // 3, k % 3
                v = pad_ref[:, pl.ds(dh * W + dw, HW)]
                if dw == 0:
                    v = v * m_l
                elif dw == 2:
                    v = v * m_r
                col_ref[pl.ds(k * C, C), :] = v

        # ---- stage 1: conv1 3x3 (BN1 scale folded) + BN1 shift + PReLU -----------
        m_l_in = jnp.broadcast_to(m_left, (nin, HW))
        m_r_in = jnp.broadcast_to(m_right, (nin, HW))
        build_im2col(xpad_ref, xcol_ref, x_ref[0], nin, m_l_in, m_r_in)
        y1 = jnp.dot(w1_ref[...], xcol_ref[...],       # (nout, 9*nin) @ (9*nin, HW)
                     preferred_element_type=jnp.float32)
        y1 = y1 + b1_ref[...]                          # BN1 shift (f32 epilogue)
        y1 = jnp.where(y1 > 0, y1, a_ref[...] * y1)    # PReLU (scalar or per-channel)

        # ---- stage 2: conv2 3x3 (BN2 scale + conv2 bias folded) -------------------
        m_l_out = jnp.broadcast_to(m_left, (nout, HW))
        m_r_out = jnp.broadcast_to(m_right, (nout, HW))
        build_im2col(y1pad_ref, ycol_ref, y1.astype(cd), nout, m_l_out, m_r_out)
        main = jnp.dot(w2_ref[...], ycol_ref[...],     # (nout, 9*nout) @ (9*nout, HW)
                       preferred_element_type=jnp.float32) + b2_ref[...]

        # ---- residual branch + add + leaky_relu(0.2) ------------------------------
        if has_proj:
            res = jnp.dot(wr_ref[...], x_ref[0],       # (nout, nin) @ (nin, HW)
                          preferred_element_type=jnp.float32) + br_ref[...]
        else:
            res = x_ref[0].astype(jnp.float32)         # identity residual (nin == nout)

        y = main + res
        y = jnp.where(y > 0, y, jnp.float32(0.2) * y)
        o_ref[0] = y.astype(o_ref.dtype)               # lane-dense (nout, HW) store

    return kernel


def _fused_call(x_flat, w1, b1, alpha, w2, b2, wr, br, *, H, W,
                compute_dtype, out_dtype):
    N, nin, HW = x_flat.shape
    nout = w1.shape[0]
    has_proj = wr is not None
    PAD = W + 1
    kernel = _make_fused_kernel(H, W, nin, nout, has_proj, compute_dtype)

    def rep(n):                                        # weights: same block every step
        return (0, 0)

    in_specs = [
        pl.BlockSpec((1, nin, HW), lambda n: (n, 0, 0)),   # x tile (C, HW)
        pl.BlockSpec((nout, 9 * nin), rep),                # conv1 weights (scale folded)
        pl.BlockSpec((nout, 1), rep),                      # BN1 shift
        pl.BlockSpec((nout, 1), rep),                      # PReLU alpha (per-channel)
        pl.BlockSpec((nout, 9 * nout), rep),               # conv2 weights (scale folded)
        pl.BlockSpec((nout, 1), rep),                      # BN2 shift (+conv2 bias)
    ]
    args = [x_flat, w1, b1, alpha, w2, b2]
    if has_proj:
        in_specs += [pl.BlockSpec((nout, nin), rep),       # 1x1 residual conv
                     pl.BlockSpec((nout, 1), rep)]         # BNr shift
        args += [wr, br]

    cd_b = jnp.dtype(compute_dtype).itemsize
    od_b = jnp.dtype(out_dtype).itemsize
    vmem_est = (2 * (nin * cd_b + nout * od_b) * HW                      # dbl-buffered IO
                + (nin + nout) * (HW + 2 * PAD) * cd_b                   # halo scratches
                + 9 * (nin + nout) * HW * cd_b                           # im2col scratches
                + (9 * nin * nout + 9 * nout * nout + nin * nout + 4 * nout) * 4)
    vmem_limit = int(min(100 * 2 ** 20, max(32 * 2 ** 20, 2 * vmem_est)))

    return pl.pallas_call(
        kernel,
        out_shape=jax.ShapeDtypeStruct((N, nout, HW), out_dtype),
        grid_spec=pltpu.PrefetchScalarGridSpec(
            num_scalar_prefetch=0,
            grid=(N,),
            in_specs=in_specs,
            out_specs=pl.BlockSpec((1, nout, HW), lambda n: (n, 0, 0)),
            scratch_shapes=[
                pltpu.VMEM((nin, HW + 2 * PAD), compute_dtype),   # flat haloed x
                pltpu.VMEM((nout, HW + 2 * PAD), compute_dtype),  # flat haloed y1
                pltpu.VMEM((9 * nin, HW), compute_dtype),         # im2col stage 1
                pltpu.VMEM((9 * nout, HW), compute_dtype),        # im2col stage 2
            ],
        ),
        compiler_params=pltpu.CompilerParams(
            dimension_semantics=("parallel",),
            vmem_limit_bytes=vmem_limit),
    )(*args)


# ------------------------------ parameter prep ------------------------------ #

def _fold_bn(bn):
    gamma, beta, mean, var = bn
    scale = gamma / jnp.sqrt(var + BN_EPS)
    shift = beta - mean * scale
    return scale, shift


def _prep(params, compute_dtype):
    cd = compute_dtype
    w1 = params["w1"]                                   # (nout, nin, 3, 3)
    nout, nin = w1.shape[0], w1.shape[1]

    # conv1 (3x3, no bias) + BN1: fold scale into weights, keep shift
    s1, sh1 = _fold_bn(params["bn1"])
    w1t = (jnp.transpose(w1, (0, 2, 3, 1)).reshape(nout, 9 * nin)
           * s1[:, None]).astype(cd)                    # col = (kh*3+kw)*nin + ci
    b1 = sh1.reshape(nout, 1).astype(jnp.float32)

    # conv2 (3x3, bias) + BN2: fold scale into weights, fold conv bias into shift
    s2, sh2 = _fold_bn(params["bn2"])
    w2t = (jnp.transpose(params["w2"], (0, 2, 3, 1)).reshape(nout, 9 * nout)
           * s2[:, None]).astype(cd)
    b2 = (sh2 + params["b2"] * s2).reshape(nout, 1).astype(jnp.float32)

    # PReLU: supports scalar (nn.PReLU()) or per-channel (num_parameters=nout)
    alpha = jnp.broadcast_to(jnp.asarray(params["prelu_a"], jnp.float32).reshape(-1),
                             (nout,)).reshape(nout, 1)

    # residual: 1x1 conv + BNr only when nin != nout; identity otherwise
    if params["wr"] is not None:
        sr, shr = _fold_bn(params["bnr"])
        wrt = (params["wr"][:, :, 0, 0] * sr[:, None]).astype(cd)   # (nout, nin)
        br = shr.reshape(nout, 1).astype(jnp.float32)
    else:
        wrt = br = None
    return w1t, b1, alpha, w2t, b2, wrt, br


@functools.partial(jax.jit, static_argnames=("compute_dtype", "out_dtype"))
def residual_conv_forward(x_nchw, params, *, compute_dtype=jnp.float32,
                          out_dtype=jnp.float32):
    """x_nchw: (N, nin, H, W) -> (N, nout, H, W). Kernel is NCHW-native
    (channels on sublanes, flattened HW on lanes): no layout transposes."""
    N, nin, H, W = x_nchw.shape
    w1t, b1, alpha, w2t, b2, wrt, br = _prep(params, compute_dtype)
    nout = w1t.shape[0]
    x_flat = x_nchw.reshape(N, nin, H * W).astype(compute_dtype)
    out = _fused_call(x_flat, w1t, b1, alpha, w2t, b2, wrt, br,
                      H=H, W=W, compute_dtype=compute_dtype, out_dtype=out_dtype)
    return out.reshape(N, nout, H, W)


# --------------------------------- params ----------------------------------- #

def init_params(key, nin, nout):
    ks = jax.random.split(key, 16)
    p = {}
    # convBatch: Conv2d(nin, nout, 3, pad=1, bias=False) + BN + PReLU
    p["w1"] = jax.random.normal(ks[0], (nout, nin, 3, 3), jnp.float32) * 0.1
    p["bn1"] = (jax.random.uniform(ks[1], (nout,), minval=0.5, maxval=1.5),
                jax.random.normal(ks[2], (nout,)) * 0.1,
                jax.random.normal(ks[3], (nout,)) * 0.1,
                jax.random.uniform(ks[4], (nout,), minval=0.5, maxval=1.5))
    p["prelu_a"] = jnp.float32(0.25)
    # Conv2d(nout, nout, 3, pad=1, bias=True) + BN
    p["w2"] = jax.random.normal(ks[5], (nout, nout, 3, 3), jnp.float32) * 0.1
    p["b2"] = jax.random.normal(ks[6], (nout,)) * 0.1
    p["bn2"] = (jax.random.uniform(ks[7], (nout,), minval=0.5, maxval=1.5),
                jax.random.normal(ks[8], (nout,)) * 0.1,
                jax.random.normal(ks[9], (nout,)) * 0.1,
                jax.random.uniform(ks[10], (nout,), minval=0.5, maxval=1.5))
    # residual branch (only if nin != nout): Conv2d(nin, nout, 1, bias=False) + BN
    if nin != nout:
        p["wr"] = jax.random.normal(ks[11], (nout, nin, 1, 1), jnp.float32) * 0.1
        p["bnr"] = (jax.random.uniform(ks[12], (nout,), minval=0.5, maxval=1.5),
                    jax.random.normal(ks[13], (nout,)) * 0.1,
                    jax.random.normal(ks[14], (nout,)) * 0.1,
                    jax.random.uniform(ks[15], (nout,), minval=0.5, maxval=1.5))
    else:
        p["wr"] = None
        p["bnr"] = None
    return p


# ----------------------------- pure-JAX reference --------------------------- #

def _reference(x_nchw, params):
    dn = ("NCHW", "OIHW", "NCHW")
    nout = params["w1"].shape[0]

    def bn(x, bnp):
        g, b, m, v = bnp
        s = g / jnp.sqrt(v + BN_EPS)
        return (x - m[None, :, None, None]) * s[None, :, None, None] + b[None, :, None, None]

    y = lax.conv_general_dilated(x_nchw, params["w1"], (1, 1), "SAME",
                                 dimension_numbers=dn)
    y = bn(y, params["bn1"])
    a = jnp.broadcast_to(jnp.asarray(params["prelu_a"], jnp.float32).reshape(-1),
                         (nout,)).reshape(1, nout, 1, 1)
    y = jnp.where(y > 0, y, a * y)                               # PReLU
    y = lax.conv_general_dilated(y, params["w2"], (1, 1), "SAME",
                                 dimension_numbers=dn)
    y = y + params["b2"][None, :, None, None]
    y = bn(y, params["bn2"])
    if params["wr"] is not None:
        r = lax.conv_general_dilated(x_nchw, params["wr"], (1, 1), "SAME",
                                     dimension_numbers=dn)
        r = bn(r, params["bnr"])
    else:
        r = x_nchw
    out = y + r
    return jnp.where(out > 0, out, 0.2 * out)                    # leaky_relu(0.2)


# ----------------------------------- main ----------------------------------- #

if __name__ == "__main__":
    key = jax.random.PRNGKey(0)
    k_x, k_p = jax.random.split(key)

    N, nin, nout, H, W = 2, 4, 8, 16, 16
    x = jax.random.normal(k_x, (N, nin, H, W), jnp.float32)
    params = init_params(k_p, nin, nout)
    ref = jax.block_until_ready(_reference(x, params))

    # f32 path (exact semantics)
    out = jax.block_until_ready(residual_conv_forward(x, params))
    assert out.shape == (N, nout, H, W), out.shape
    assert jnp.allclose(out, ref, rtol=1e-4, atol=1e-4), \
        float(jnp.max(jnp.abs(out - ref)))

    # bf16 streaming path (bf16 MXU inputs + bf16 output, f32 accumulate/epilogue)
    out_bf16 = jax.block_until_ready(
        residual_conv_forward(x, params, compute_dtype=jnp.bfloat16,
                              out_dtype=jnp.bfloat16))
    assert jnp.allclose(out_bf16.astype(jnp.float32), ref, rtol=5e-2, atol=5e-2), \
        float(jnp.max(jnp.abs(out_bf16.astype(jnp.float32) - ref)))

    # identity-residual specialisation (nin == nout) + per-channel PReLU alpha
    x_id = jax.random.normal(k_x, (N, nout, H, W), jnp.float32)
    params_id = init_params(k_p, nout, nout)
    params_id["prelu_a"] = jax.random.uniform(jax.random.PRNGKey(7), (nout,),
                                              minval=0.1, maxval=0.4)
    out_id = jax.block_until_ready(residual_conv_forward(x_id, params_id))
    ref_id = jax.block_until_ready(_reference(x_id, params_id))
    assert jnp.allclose(out_id, ref_id, rtol=1e-4, atol=1e-4), \
        float(jnp.max(jnp.abs(out_id - ref_id)))

    print("KERNEL_OK")
</pallas_src>

<mosaic_0001>
module attributes {stable_mosaic.version = 11 : i64} {
  func.func @kernel(%arg0: i32, %arg1: memref<1x4x256xf32, #tpu.memory_space<vmem>>, %arg2: memref<8x36xf32, #tpu.memory_space<vmem>>, %arg3: memref<8x1xf32, #tpu.memory_space<vmem>>, %arg4: memref<8x1xf32, #tpu.memory_space<vmem>>, %arg5: memref<8x72xf32, #tpu.memory_space<vmem>>, %arg6: memref<8x1xf32, #tpu.memory_space<vmem>>, %arg7: memref<8x4xf32, #tpu.memory_space<vmem>>, %arg8: memref<8x1xf32, #tpu.memory_space<vmem>>, %arg9: memref<1x8x256xf32, #tpu.memory_space<vmem>>, %arg10: memref<4x290xf32, #tpu.memory_space<vmem>>, %arg11: memref<8x290xf32, #tpu.memory_space<vmem>>, %arg12: memref<36x256xf32, #tpu.memory_space<vmem>>, %arg13: memref<72x256xf32, #tpu.memory_space<vmem>>) attributes {dimension_semantics = [#tpu.dimension_semantics<parallel>], iteration_bounds = array<i64: 2>, scalar_prefetch = 0 : i64, scratch_operands = 4 : i64, tpu.core_type = #tpu.core_type<tc>, window_params = [{transform_indices = @transform_0, window_bounds = array<i64: 1, 4, 256>}, {pipeline_mode = #tpu.pipeline_mode<synchronous>, transform_indices = @transform_1, window_bounds = array<i64: 8, 36>}, {pipeline_mode = #tpu.pipeline_mode<synchronous>, transform_indices = @transform_2, window_bounds = array<i64: 8, 1>}, {pipeline_mode = #tpu.pipeline_mode<synchronous>, transform_indices = @transform_3, window_bounds = array<i64: 8, 1>}, {pipeline_mode = #tpu.pipeline_mode<synchronous>, transform_indices = @transform_4, window_bounds = array<i64: 8, 72>}, {pipeline_mode = #tpu.pipeline_mode<synchronous>, transform_indices = @transform_5, window_bounds = array<i64: 8, 1>}, {pipeline_mode = #tpu.pipeline_mode<synchronous>, transform_indices = @transform_6, window_bounds = array<i64: 8, 4>}, {pipeline_mode = #tpu.pipeline_mode<synchronous>, transform_indices = @transform_7, window_bounds = array<i64: 8, 1>}, {transform_indices = @transform_8, window_bounds = array<i64: 1, 8, 256>}]} {
    %0 = tpu.iota {dimensions = array<i32: 1>} : vector<1x256xi32>
    %c16_i32 = arith.constant 16 : i32
    %c0_i32 = arith.constant 0 : i32
    %1 = arith.cmpi eq, %c16_i32, %c0_i32 : i32
    %c1_i32 = arith.constant 1 : i32
    %2 = arith.select %1, %c1_i32, %c16_i32 : i32
    %3 = vector.broadcast %2 : i32 to vector<1x256xi32>
    %4 = arith.remsi %0, %3 : vector<1x256xi32>
    %c0_i32_0 = arith.constant 0 : i32
    %5 = vector.broadcast %c0_i32_0 : i32 to vector<1x256xi32>
    %6 = arith.cmpi ne, %4, %5 : vector<1x256xi32>
    %c0_i32_1 = arith.constant 0 : i32
    %7 = vector.broadcast %c0_i32_1 : i32 to vector<1x256xi32>
    %8 = arith.cmpi slt, %4, %7 : vector<1x256xi32>
    %c0_i32_2 = arith.constant 0 : i32
    %9 = arith.cmpi slt, %2, %c0_i32_2 : i32
    %10 = vector.broadcast %9 : i1 to vector<1x256xi1>
    %11 = vector.broadcast %10 : vector<1x256xi1> to vector<1x256xi1>
    %12 = arith.xori %8, %11 : vector<1x256xi1>
    %13 = arith.andi %12, %6 : vector<1x256xi1>
    %14 = vector.broadcast %2 : i32 to vector<1x256xi32>
    %15 = arith.addi %4, %14 : vector<1x256xi32>
    %16 = arith.select %13, %15, %4 : vector<1x256xi1>, vector<1x256xi32>
    %c0_i32_3 = arith.constant 0 : i32
    %17 = vector.broadcast %c0_i32_3 : i32 to vector<1x256xi32>
    %18 = arith.cmpi ne, %16, %17 : vector<1x256xi32>
    %19 = arith.extui %18 : vector<1x256xi1> to vector<1x256xi32>
    %20 = arith.sitofp %19 : vector<1x256xi32> to vector<1x256xf32>
    %c15_i32 = arith.constant 15 : i32
    %21 = vector.broadcast %c15_i32 : i32 to vector<1x256xi32>
    %22 = arith.cmpi ne, %16, %21 : vector<1x256xi32>
    %23 = arith.extui %22 : vector<1x256xi1> to vector<1x256xi32>
    %24 = arith.sitofp %23 : vector<1x256xi32> to vector<1x256xf32>
    %25 = vector.shape_cast %20 : vector<1x256xf32> to vector<1x256xf32>
    %26 = vector.broadcast %25 : vector<1x256xf32> to vector<4x256xf32>
    %27 = vector.shape_cast %24 : vector<1x256xf32> to vector<1x256xf32>
    %28 = vector.broadcast %27 : vector<1x256xf32> to vector<4x256xf32>
    %c0 = arith.constant 0 : index
    %c0_4 = arith.constant 0 : index
    %c0_5 = arith.constant 0 : index
    %29 = vector.load %arg1[%c0, %c0_4, %c0_5] : memref<1x4x256xf32, #tpu.memory_space<vmem>>, vector<1x4x256xf32>
    %30 = vector.shape_cast %29 : vector<1x4x256xf32> to vector<4x256xf32>
    %cst = arith.constant 0.000000e+00 : f32
    %31 = vector.broadcast %cst : f32 to vector<4x17xf32>
    %c0_6 = arith.constant 0 : index
    %c0_7 = arith.constant 0 : index
    %32 = vector.load %arg10[%c0_6, %c0_7] : memref<4x290xf32, #tpu.memory_space<vmem>>, vector<4x17xf32>
    tpu.vector_store %arg10[%c0_6, %c0_7], %31 {strides = array<i32>} : memref<4x290xf32, #tpu.memory_space<vmem>>, vector<4x17xf32>,
    %cst_8 = arith.constant 0.000000e+00 : f32
    %33 = vector.broadcast %cst_8 : f32 to vector<4x17xf32>
    %c0_9 = arith.constant 0 : index
    %c273 = arith.constant 273 : index
    %34 = vector.load %arg10[%c0_9, %c273] : memref<4x290xf32, #tpu.memory_space<vmem>>, vector<4x17xf32>
    tpu.vector_store %arg10[%c0_9, %c273], %33 {strides = array<i32>} : memref<4x290xf32, #tpu.memory_space<vmem>>, vector<4x17xf32>,
    %c0_10 = arith.constant 0 : index
    %c17 = arith.constant 17 : index
    %35 = vector.load %arg10[%c0_10, %c17] : memref<4x290xf32, #tpu.memory_space<vmem>>, vector<4x256xf32>
    tpu.vector_store %arg10[%c0_10, %c17], %30 {strides = array<i32>} : memref<4x290xf32, #tpu.memory_space<vmem>>, vector<4x256xf32>,
    %c0_11 = arith.constant 0 : index
    %c0_12 = arith.constant 0 : index
    %36 = vector.load %arg10[%c0_11, %c0_12] : memref<4x290xf32, #tpu.memory_space<vmem>>, vector<4x256xf32>
    %37 = arith.mulf %36, %26 : vector<4x256xf32>
    %c0_13 = arith.constant 0 : index
    %c0_14 = arith.constant 0 : index
    %38 = vector.load %arg12[%c0_13, %c0_14] : memref<36x256xf32, #tpu.memory_space<vmem>>, vector<4x256xf32>
    tpu.vector_store %arg12[%c0_13, %c0_14], %37 {strides = array<i32>} : memref<36x256xf32, #tpu.memory_space<vmem>>, vector<4x256xf32>,
    %c0_15 = arith.constant 0 : index
    %c1 = arith.constant 1 : index
    %39 = vector.load %arg10[%c0_15, %c1] : memref<4x290xf32, #tpu.memory_space<vmem>>, vector<4x256xf32>
    %c4 = arith.constant 4 : index
    %c0_16 = arith.constant 0 : index
    %40 = vector.load %arg12[%c4, %c0_16] : memref<36x256xf32, #tpu.memory_space<vmem>>, vector<4x256xf32>
    tpu.vector_store %arg12[%c4, %c0_16], %39 {strides = array<i32>} : memref<36x256xf32, #tpu.memory_space<vmem>>, vector<4x256xf32>,
    %c0_17 = arith.constant 0 : index
    %c2 = arith.constant 2 : index
    %41 = vector.load %arg10[%c0_17, %c2] : memref<4x290xf32, #tpu.memory_space<vmem>>, vector<4x256xf32>
    %42 = arith.mulf %41, %28 : vector<4x256xf32>
    %c8 = arith.constant 8 : index
    %c0_18 = arith.constant 0 : index
    %43 = vector.load %arg12[%c8, %c0_18] : memref<36x256xf32, #tpu.memory_space<vmem>>, vector<4x256xf32>
    tpu.vector_store %arg12[%c8, %c0_18], %42 {strides = array<i32>} : memref<36x256xf32, #tpu.memory_space<vmem>>, vector<4x256xf32>,
    %c0_19 = arith.constant 0 : index
    %c16 = arith.constant 16 : index
    %44 = vector.load %arg10[%c0_19, %c16] : memref<4x290xf32, #tpu.memory_space<vmem>>, vector<4x256xf32>
    %45 = arith.mulf %44, %26 : vector<4x256xf32>
    %c12 = arith.constant 12 : index
    %c0_20 = arith.constant 0 : index
    %46 = vector.load %arg12[%c12, %c0_20] : memref<36x256xf32, #tpu.memory_space<vmem>>, vector<4x256xf32>
    tpu.vector_store %arg12[%c12, %c0_20], %45 {strides = array<i32>} : memref<36x256xf32, #tpu.memory_space<vmem>>, vector<4x256xf32>,
    %c0_21 = arith.constant 0 : index
    %c17_22 = arith.constant 17 : index
    %47 = vector.load %arg10[%c0_21, %c17_22] : memref<4x290xf32, #tpu.memory_space<vmem>>, vector<4x256xf32>
    %c16_23 = arith.constant 16 : index
    %c0_24 = arith.constant 0 : index
    %48 = vector.load %arg12[%c16_23, %c0_24] : memref<36x256xf32, #tpu.memory_space<vmem>>, vector<4x256xf32>
    tpu.vector_store %arg12[%c16_23, %c0_24], %47 {strides = array<i32>} : memref<36x256xf32, #tpu.memory_space<vmem>>, vector<4x256xf32>,
    %c0_25 = arith.constant 0 : index
    %c18 = arith.constant 18 : index
    %49 = vector.load %arg10[%c0_25, %c18] : memref<4x290xf32, #tpu.memory_space<vmem>>, vector<4x256xf32>
    %50 = arith.mulf %49, %28 : vector<4x256xf32>
    %c20 = arith.constant 20 : index
    %c0_26 = arith.constant 0 : index
    %51 = vector.load %arg12[%c20, %c0_26] : memref<36x256xf32, #tpu.memory_space<vmem>>, vector<4x256xf32>
    tpu.vector_store %arg12[%c20, %c0_26], %50 {strides = array<i32>} : memref<36x256xf32, #tpu.memory_space<vmem>>, vector<4x256xf32>,
    %c0_27 = arith.constant 0 : index
    %c32 = arith.constant 32 : index
    %52 = vector.load %arg10[%c0_27, %c32] : memref<4x290xf32, #tpu.memory_space<vmem>>, vector<4x256xf32>
    %53 = arith.mulf %52, %26 : vector<4x256xf32>
    %c24 = arith.constant 24 : index
    %c0_28 = arith.constant 0 : index
    %54 = vector.load %arg12[%c24, %c0_28] : memref<36x256xf32, #tpu.memory_space<vmem>>, vector<4x256xf32>
    tpu.vector_store %arg12[%c24, %c0_28], %53 {strides = array<i32>} : memref<36x256xf32, #tpu.memory_space<vmem>>, vector<4x256xf32>,
    %c0_29 = arith.constant 0 : index
    %c33 = arith.constant 33 : index
    %55 = vector.load %arg10[%c0_29, %c33] : memref<4x290xf32, #tpu.memory_space<vmem>>, vector<4x256xf32>
    %c28 = arith.constant 28 : index
    %c0_30 = arith.constant 0 : index
    %56 = vector.load %arg12[%c28, %c0_30] : memref<36x256xf32, #tpu.memory_space<vmem>>, vector<4x256xf32>
    tpu.vector_store %arg12[%c28, %c0_30], %55 {strides = array<i32>} : memref<36x256xf32, #tpu.memory_space<vmem>>, vector<4x256xf32>,
    %c0_31 = arith.constant 0 : index
    %c34 = arith.constant 34 : index
    %57 = vector.load %arg10[%c0_31, %c34] : memref<4x290xf32, #tpu.memory_space<vmem>>, vector<4x256xf32>
    %58 = arith.mulf %57, %28 : vector<4x256xf32>
    %c32_32 = arith.constant 32 : index
    %c0_33 = arith.constant 0 : index
    %59 = vector.load %arg12[%c32_32, %c0_33] : memref<36x256xf32, #tpu.memory_space<vmem>>, vector<4x256xf32>
    tpu.vector_store %arg12[%c32_32, %c0_33], %58 {strides = array<i32>} : memref<36x256xf32, #tpu.memory_space<vmem>>, vector<4x256xf32>,
    %c0_34 = arith.constant 0 : index
    %c0_35 = arith.constant 0 : index
    %60 = vector.load %arg2[%c0_34, %c0_35] : memref<8x36xf32, #tpu.memory_space<vmem>>, vector<8x36xf32>
    %c0_36 = arith.constant 0 : index
    %c0_37 = arith.constant 0 : index
    %61 = vector.load %arg12[%c0_36, %c0_37] : memref<36x256xf32, #tpu.memory_space<vmem>>, vector<36x256xf32>
    %cst_38 = arith.constant dense<0.000000e+00> : vector<8x256xf32>
    %62 = tpu.matmul %60, %61, %cst_38 {dimension_numbers = #tpu.dot_dimension_numbers<[1], [0], [0], [1], [0, 0, 1, 1], [], []>} : vector<8x36xf32>, vector<36x256xf32>, vector<8x256xf32> -> vector<8x256xf32>
    %c0_39 = arith.constant 0 : index
    %c0_40 = arith.constant 0 : index
    %63 = vector.load %arg3[%c0_39, %c0_40] : memref<8x1xf32, #tpu.memory_space<vmem>>, vector<8x1xf32>
    %64 = vector.broadcast %63 : vector<8x1xf32> to vector<8x256xf32>
    %65 = arith.addf %62, %64 : vector<8x256xf32>
    %cst_41 = arith.constant 0.000000e+00 : f32
    %66 = vector.broadcast %cst_41 : f32 to vector<8x256xf32>
    %67 = arith.cmpf ogt, %65, %66 : vector<8x256xf32>
    %c0_42 = arith.constant 0 : index
    %c0_43 = arith.constant 0 : index
    %68 = vector.load %arg4[%c0_42, %c0_43] : memref<8x1xf32, #tpu.memory_space<vmem>>, vector<8x1xf32>
    %69 = vector.broadcast %68 : vector<8x1xf32> to vector<8x256xf32>
    %70 = arith.mulf %69, %65 : vector<8x256xf32>
    %71 = arith.select %67, %65, %70 : vector<8x256xi1>, vector<8x256xf32>
    %72 = vector.shape_cast %20 : vector<1x256xf32> to vector<1x256xf32>
    %73 = vector.broadcast %72 : vector<1x256xf32> to vector<8x256xf32>
    %74 = vector.shape_cast %24 : vector<1x256xf32> to vector<1x256xf32>
    %75 = vector.broadcast %74 : vector<1x256xf32> to vector<8x256xf32>
    %cst_44 = arith.constant 0.000000e+00 : f32
    %76 = vector.broadcast %cst_44 : f32 to vector<8x17xf32>
    %c0_45 = arith.constant 0 : index
    %c0_46 = arith.constant 0 : index
    %77 = vector.load %arg11[%c0_45, %c0_46] : memref<8x290xf32, #tpu.memory_space<vmem>>, vector<8x17xf32>
    tpu.vector_store %arg11[%c0_45, %c0_46], %76 {strides = array<i32>} : memref<8x290xf32, #tpu.memory_space<vmem>>, vector<8x17xf32>,
    %cst_47 = arith.constant 0.000000e+00 : f32
    %78 = vector.broadcast %cst_47 : f32 to vector<8x17xf32>
    %c0_48 = arith.constant 0 : index
    %c273_49 = arith.constant 273 : index
    %79 = vector.load %arg11[%c0_48, %c273_49] : memref<8x290xf32, #tpu.memory_space<vmem>>, vector<8x17xf32>
    tpu.vector_store %arg11[%c0_48, %c273_49], %78 {strides = array<i32>} : memref<8x290xf32, #tpu.memory_space<vmem>>, vector<8x17xf32>,
    %c0_50 = arith.constant 0 : index
    %c17_51 = arith.constant 17 : index
    %80 = vector.load %arg11[%c0_50, %c17_51] : memref<8x290xf32, #tpu.memory_space<vmem>>, vector<8x256xf32>
    tpu.vector_store %arg11[%c0_50, %c17_51], %71 {strides = array<i32>} : memref<8x290xf32, #tpu.memory_space<vmem>>, vector<8x256xf32>,
    %c0_52 = arith.constant 0 : index
    %c0_53 = arith.constant 0 : index
    %81 = vector.load %arg11[%c0_52, %c0_53] : memref<8x290xf32, #tpu.memory_space<vmem>>, vector<8x256xf32>
    %82 = arith.mulf %81, %73 : vector<8x256xf32>
    %c0_54 = arith.constant 0 : index
    %c0_55 = arith.constant 0 : index
    %83 = vector.load %arg13[%c0_54, %c0_55] : memref<72x256xf32, #tpu.memory_space<vmem>>, vector<8x256xf32>
    tpu.vector_store %arg13[%c0_54, %c0_55], %82 {strides = array<i32>} : memref<72x256xf32, #tpu.memory_space<vmem>>, vector<8x256xf32>,
    %c0_56 = arith.constant 0 : index
    %c1_57 = arith.constant 1 : index
    %84 = vector.load %arg11[%c0_56, %c1_57] : memref<8x290xf32, #tpu.memory_space<vmem>>, vector<8x256xf32>
    %c8_58 = arith.constant 8 : index
    %c0_59 = arith.constant 0 : index
    %85 = vector.load %arg13[%c8_58, %c0_59] : memref<72x256xf32, #tpu.memory_space<vmem>>, vector<8x256xf32>
    tpu.vector_store %arg13[%c8_58, %c0_59], %84 {strides = array<i32>} : memref<72x256xf32, #tpu.memory_space<vmem>>, vector<8x256xf32>,
    %c0_60 = arith.constant 0 : index
    %c2_61 = arith.constant 2 : index
    %86 = vector.load %arg11[%c0_60, %c2_61] : memref<8x290xf32, #tpu.memory_space<vmem>>, vector<8x256xf32>
    %87 = arith.mulf %86, %75 : vector<8x256xf32>
    %c16_62 = arith.constant 16 : index
    %c0_63 = arith.constant 0 : index
    %88 = vector.load %arg13[%c16_62, %c0_63] : memref<72x256xf32, #tpu.memory_space<vmem>>, vector<8x256xf32>
    tpu.vector_store %arg13[%c16_62, %c0_63], %87 {strides = array<i32>} : memref<72x256xf32, #tpu.memory_space<vmem>>, vector<8x256xf32>,
    %c0_64 = arith.constant 0 : index
    %c16_65 = arith.constant 16 : index
    %89 = vector.load %arg11[%c0_64, %c16_65] : memref<8x290xf32, #tpu.memory_space<vmem>>, vector<8x256xf32>
    %90 = arith.mulf %89, %73 : vector<8x256xf32>
    %c24_66 = arith.constant 24 : index
    %c0_67 = arith.constant 0 : index
    %91 = vector.load %arg13[%c24_66, %c0_67] : memref<72x256xf32, #tpu.memory_space<vmem>>, vector<8x256xf32>
    tpu.vector_store %arg13[%c24_66, %c0_67], %90 {strides = array<i32>} : memref<72x256xf32, #tpu.memory_space<vmem>>, vector<8x256xf32>,
    %c0_68 = arith.constant 0 : index
    %c17_69 = arith.constant 17 : index
    %92 = vector.load %arg11[%c0_68, %c17_69] : memref<8x290xf32, #tpu.memory_space<vmem>>, vector<8x256xf32>
    %c32_70 = arith.constant 32 : index
    %c0_71 = arith.constant 0 : index
    %93 = vector.load %arg13[%c32_70, %c0_71] : memref<72x256xf32, #tpu.memory_space<vmem>>, vector<8x256xf32>
    tpu.vector_store %arg13[%c32_70, %c0_71], %92 {strides = array<i32>} : memref<72x256xf32, #tpu.memory_space<vmem>>, vector<8x256xf32>,
    %c0_72 = arith.constant 0 : index
    %c18_73 = arith.constant 18 : index
    %94 = vector.load %arg11[%c0_72, %c18_73] : memref<8x290xf32, #tpu.memory_space<vmem>>, vector<8x256xf32>
    %95 = arith.mulf %94, %75 : vector<8x256xf32>
    %c40 = arith.constant 40 : index
    %c0_74 = arith.constant 0 : index
    %96 = vector.load %arg13[%c40, %c0_74] : memref<72x256xf32, #tpu.memory_space<vmem>>, vector<8x256xf32>
    tpu.vector_store %arg13[%c40, %c0_74], %95 {strides = array<i32>} : memref<72x256xf32, #tpu.memory_space<vmem>>, vector<8x256xf32>,
    %c0_75 = arith.constant 0 : index
    %c32_76 = arith.constant 32 : index
    %97 = vector.load %arg11[%c0_75, %c32_76] : memref<8x290xf32, #tpu.memory_space<vmem>>, vector<8x256xf32>
    %98 = arith.mulf %97, %73 : vector<8x256xf32>
    %c48 = arith.constant 48 : index
    %c0_77 = arith.constant 0 : index
    %99 = vector.load %arg13[%c48, %c0_77] : memref<72x256xf32, #tpu.memory_space<vmem>>, vector<8x256xf32>
    tpu.vector_store %arg13[%c48, %c0_77], %98 {strides = array<i32>} : memref<72x256xf32, #tpu.memory_space<vmem>>, vector<8x256xf32>,
    %c0_78 = arith.constant 0 : index
    %c33_79 = arith.constant 33 : index
    %100 = vector.load %arg11[%c0_78, %c33_79] : memref<8x290xf32, #tpu.memory_space<vmem>>, vector<8x256xf32>
    %c56 = arith.constant 56 : index
    %c0_80 = arith.constant 0 : index
    %101 = vector.load %arg13[%c56, %c0_80] : memref<72x256xf32, #tpu.memory_space<vmem>>, vector<8x256xf32>
    tpu.vector_store %arg13[%c56, %c0_80], %100 {strides = array<i32>} : memref<72x256xf32, #tpu.memory_space<vmem>>, vector<8x256xf32>,
    %c0_81 = arith.constant 0 : index
    %c34_82 = arith.constant 34 : index
    %102 = vector.load %arg11[%c0_81, %c34_82] : memref<8x290xf32, #tpu.memory_space<vmem>>, vector<8x256xf32>
    %103 = arith.mulf %102, %75 : vector<8x256xf32>
    %c64 = arith.constant 64 : index
    %c0_83 = arith.constant 0 : index
    %104 = vector.load %arg13[%c64, %c0_83] : memref<72x256xf32, #tpu.memory_space<vmem>>, vector<8x256xf32>
    tpu.vector_store %arg13[%c64, %c0_83], %103 {strides = array<i32>} : memref<72x256xf32, #tpu.memory_space<vmem>>, vector<8x256xf32>,
    %c0_84 = arith.constant 0 : index
    %c0_85 = arith.constant 0 : index
    %105 = vector.load %arg5[%c0_84, %c0_85] : memref<8x72xf32, #tpu.memory_space<vmem>>, vector<8x72xf32>
    %c0_86 = arith.constant 0 : index
    %c0_87 = arith.constant 0 : index
    %106 = vector.load %arg13[%c0_86, %c0_87] : memref<72x256xf32, #tpu.memory_space<vmem>>, vector<72x256xf32>
    %cst_88 = arith.constant dense<0.000000e+00> : vector<8x256xf32>
    %107 = tpu.matmul %105, %106, %cst_88 {dimension_numbers = #tpu.dot_dimension_numbers<[1], [0], [0], [1], [0, 0, 1, 1], [], []>} : vector<8x72xf32>, vector<72x256xf32>, vector<8x256xf32> -> vector<8x256xf32>
    %c0_89 = arith.constant 0 : index
    %c0_90 = arith.constant 0 : index
    %108 = vector.load %arg6[%c0_89, %c0_90] : memref<8x1xf32, #tpu.memory_space<vmem>>, vector<8x1xf32>
    %109 = vector.broadcast %108 : vector<8x1xf32> to vector<8x256xf32>
    %110 = arith.addf %107, %109 : vector<8x256xf32>
    %c0_91 = arith.constant 0 : index
    %c0_92 = arith.constant 0 : index
    %111 = vector.load %arg7[%c0_91, %c0_92] : memref<8x4xf32, #tpu.memory_space<vmem>>, vector<8x4xf32>
    %c0_93 = arith.constant 0 : index
    %c0_94 = arith.constant 0 : index
    %c0_95 = arith.constant 0 : index
    %112 = vector.load %arg1[%c0_93, %c0_94, %c0_95] : memref<1x4x256xf32, #tpu.memory_space<vmem>>, vector<1x4x256xf32>
    %113 = vector.shape_cast %112 : vector<1x4x256xf32> to vector<4x256xf32>
    %cst_96 = arith.constant dense<0.000000e+00> : vector<8x256xf32>
    %114 = tpu.matmul %111, %113, %cst_96 {dimension_numbers = #tpu.dot_dimension_numbers<[1], [0], [0], [1], [0, 0, 1, 1], [], []>} : vector<8x4xf32>, vector<4x256xf32>, vector<8x256xf32> -> vector<8x256xf32>
    %c0_97 = arith.constant 0 : index
    %c0_98 = arith.constant 0 : index
    %115 = vector.load %arg8[%c0_97, %c0_98] : memref<8x1xf32, #tpu.memory_space<vmem>>, vector<8x1xf32>
    %116 = vector.broadcast %115 : vector<8x1xf32> to vector<8x256xf32>
    %117 = arith.addf %114, %116 : vector<8x256xf32>
    %118 = arith.addf %110, %117 : vector<8x256xf32>
    %cst_99 = arith.constant 0.000000e+00 : f32
    %119 = vector.broadcast %cst_99 : f32 to vector<8x256xf32>
    %120 = arith.cmpf ogt, %118, %119 : vector<8x256xf32>
    %cst_100 = arith.constant 2.000000e-01 : f32
    %121 = vector.broadcast %cst_100 : f32 to vector<8x256xf32>
    %122 = arith.mulf %121, %118 : vector<8x256xf32>
    %123 = arith.select %120, %118, %122 : vector<8x256xi1>, vector<8x256xf32>
    %c0_101 = arith.constant 0 : index
    %c0_102 = arith.constant 0 : index
    %c0_103 = arith.constant 0 : index
    %124 = vector.load %arg9[%c0_101, %c0_102, %c0_103] : memref<1x8x256xf32, #tpu.memory_space<vmem>>, vector<1x8x256xf32>
    %125 = vector.shape_cast %124 : vector<1x8x256xf32> to vector<8x256xf32>
    %126 = vector.shape_cast %123 : vector<8x256xf32> to vector<1x8x256xf32>
    tpu.vector_store %arg9[%c0_101, %c0_102, %c0_103], %126 {strides = array<i32>} : memref<1x8x256xf32, #tpu.memory_space<vmem>>, vector<1x8x256xf32>,
    return
  }
  func.func @transform_0(%arg0: i32) -> (i32, i32, i32) {
    %c0_i32 = arith.constant 0 : i32
    %c0_i32_0 = arith.constant 0 : i32
    %c0_i32_1 = arith.constant 0 : i32
    return %arg0, %c0_i32, %c0_i32_0 : i32, i32, i32
  }
  func.func @transform_1(%arg0: i32) -> (i32, i32) {
    %c0_i32 = arith.constant 0 : i32
    %c0_i32_0 = arith.constant 0 : i32
    %c0_i32_1 = arith.constant 0 : i32
    return %c0_i32, %c0_i32_0 : i32, i32
  }
  func.func @transform_2(%arg0: i32) -> (i32, i32) {
    %c0_i32 = arith.constant 0 : i32
    %c0_i32_0 = arith.constant 0 : i32
    %c0_i32_1 = arith.constant 0 : i32
    return %c0_i32, %c0_i32_0 : i32, i32
  }
  func.func @transform_3(%arg0: i32) -> (i32, i32) {
    %c0_i32 = arith.constant 0 : i32
    %c0_i32_0 = arith.constant 0 : i32
    %c0_i32_1 = arith.constant 0 : i32
    return %c0_i32, %c0_i32_0 : i32, i32
  }
  func.func @transform_4(%arg0: i32) -> (i32, i32) {
    %c0_i32 = arith.constant 0 : i32
    %c0_i32_0 = arith.constant 0 : i32
    %c0_i32_1 = arith.constant 0 : i32
    return %c0_i32, %c0_i32_0 : i32, i32
  }
  func.func @transform_5(%arg0: i32) -> (i32, i32) {
    %c0_i32 = arith.constant 0 : i32
    %c0_i32_0 = arith.constant 0 : i32
    %c0_i32_1 = arith.constant 0 : i32
    return %c0_i32, %c0_i32_0 : i32, i32
  }
  func.func @transform_6(%arg0: i32) -> (i32, i32) {
    %c0_i32 = arith.constant 0 : i32
    %c0_i32_0 = arith.constant 0 : i32
    %c0_i32_1 = arith.constant 0 : i32
    return %c0_i32, %c0_i32_0 : i32, i32
  }
  func.func @transform_7(%arg0: i32) -> (i32, i32) {
    %c0_i32 = arith.constant 0 : i32
    %c0_i32_0 = arith.constant 0 : i32
    %c0_i32_1 = arith.constant 0 : i32
    return %c0_i32, %c0_i32_0 : i32, i32
  }
  func.func @transform_8(%arg0: i32) -> (i32, i32, i32) {
    %c0_i32 = arith.constant 0 : i32
    %c0_i32_0 = arith.constant 0 : i32
    %c0_i32_1 = arith.constant 0 : i32
    return %arg0, %c0_i32, %c0_i32_0 : i32, i32, i32
  }
}

</mosaic_0001>

<bundles_post_ra>
// kernel: residual_conv_forward.1
= control target key start
LH: loop header
LB: loop body
LE: loop exit
PB: predicated region body
PF: predicated region fallthrough
CT: control target
= control target key end

     0   :  { %s1299_s27 = smov 0   ;;  %s1518_s0 = inlined_call_operand.vmem [shape: f32[2,4,256], index: 0, kind: input, shape index: {}]   ;;  %s1519_s1 = inlined_call_operand.vmem [shape: f32[8,36], index: 1, kind: input, shape index: {}]   ;;  %s1520_s2 = inlined_call_operand.vmem [shape: f32[8,1], index: 2, kind: input, shape index: {}]   ;;  %s1521_s3 = inlined_call_operand.vmem [shape: f32[8,1], index: 3, kind: input, shape index: {}]   ;;  %s1522_s4 = inlined_call_operand.vmem [shape: f32[8,72], index: 4, kind: input, shape index: {}]   ;;  %s1523_s5 = inlined_call_operand.vmem [shape: f32[8,1], index: 5, kind: input, shape index: {}]   ;;  %s1524_s6 = inlined_call_operand.vmem [shape: f32[8,4], index: 6, kind: input, shape index: {}]   ;;  %s1525_s7 = inlined_call_operand.vmem [shape: f32[8,1], index: 7, kind: input, shape index: {}]   ;;  %s1526_s8 = inlined_call_operand.vmem [shape: f32[2,8,256], index: 8, kind: output, shape index: {}]  }
   0x1 LB: > { %s1111_s28 = sadd.s32 4294967295, %s1236_s27   ;;  %p1115_p0 = scmp.ge.s32.totalorder %s1236_s27, 1  ;;  %s1236_s27 = sphi %s1299_s27, %s18_s27  }
   0x2   : > { %p262_p1 = scmp.lt.s32.totalorder %s1236_s27, 3 }
   0x4   : > { %p263_p2 = pnand %p1115_p0, %p262_p1 }
   0x5   : > { %p296_p3 = scmp.lt.s32.totalorder (!%p263_p2), %s1111_s28, 1  ;;  %s1238_s11 = smov (!%p263_p2), 17  }
   0x6   : > { %266 = sbr.rel (%p263_p2) target bundleno = 901 (0x385), region = 52  ;;  %s1240_s12 = smov (!%p263_p2), 16  }
   0x7   : > { %s1241_s13 = smov (!%p263_p2), 32   ;;  %s1242_s14 = smov (!%p263_p2), 2  }
   0x8   : > { %s1243_s15 = smov (!%p263_p2), 18   ;;  %s1244_s16 = smov (!%p263_p2), 34  }
   0x9   : > { %s1245_s17 = smov (!%p263_p2), 126   ;;  %s1246_s18 = smov (!%p263_p2), 112  }
   0xa   : > { %s1247_s19 = smov (!%p263_p2), 111   ;;  %s1248_s20 = smov (!%p263_p2), 110  }
   0xb   : > { %v306_v0 = vlaneseq  ;;  %s1534_s28 = smov (!%p296_p3, %s1111_s28), 1  ;;  %vm367_vm3 = vcmask 1043456   ;;  %v1239_v6 = vmov 0.0   ;;  %vm346_vm5 = vcmask 134144   ;;  %s1249_s21 = smov 96  }
   0xc   : > { %s1136_s29 = sshll.u32 %s1534_s28, 3  ;;  %vm348_vm6 = vcmask 273544   ;;  %347 = vst.msk [vmem:[#allocation2] sm:$0xf] %vm346_vm5, %v1239_v6  ;;  %vm354_vm7 = vcmask 138240   ;;  %vm358_vm8 = vcmask 1043592  }
   0xd   : > { %v307_v1 = vand.u32 127, %v306_v0  ;;  %s300_s10 = scalar_lea.vmem %s1518_s0, %s1136_s29  ;;  %349 = vst.msk [vmem:[#allocation2 + $0x8] sm:$0xf] %vm348_vm6, %v1239_v6  ;;  %vm359_vm9 = vcmask 1047556   ;;  %vm412_vm11 = vcmask 15360   ;;  %vm444_vm12 = vcmask 130048  }
   0xe   : > { %v1313_v4 = vld [vmem:[%s300_s10] sm:$0xff]  ;;  %695 = vst.msk [vmem:[#allocation3] sm:$0xff] %vm354_vm7, %v1239_v6  ;;  %vm360_vm10 = vmor %vm359_vm9, %vm358_vm8  ;;  %vm500_vm13 = vcmask 146432   ;;  %vm533_vm14 = vcmask 261120   ;;  %s1250_s22 = smov 95   ;;  %vm589_vm15 = vcmask 277504  }
   0xf   : > { %v308_v2 = vadd.s32 128, %v307_v1  ;;  %v313_v3 = vand.u32 15, %v307_v1  ;;  %351 = vrot.lane.b32.xlu0 %v1313_v4, %s1238_s11  ;;  %s1251_s23 = smov 94   ;;  %s1252_s24 = smov 127   ;;  %vm577_vm6 = vcmask 777216   ;;  %vm609_vm8 = vcmask 769024  }
  0x10   : > { %vm1527_vm9 = vcmask 1039360  }
  0x11   : > { %v320_v5 = vand.u32 15, %v308_v2  ;;  %vm333_vm0 = vcmp.ne.s32.totalorder %v313_v3, 0  ;;  %vm339_vm1 = vcmp.ne.s32.totalorder %v313_v3, 15 }
  0x12   : > { %v1318_v7 = vsel %vm333_vm0, 1.0, %v1239_v6  ;;  %v1324_v9 = vsel %vm339_vm1, 1.0, %v1239_v6  ;;  %vm1528_vm0 = vcmask 1031168   ;;  %vm465_vm1 = vcmask 916480  }
  0x13   : > { %vm334_vm2 = vcmp.ne.s32.totalorder %v320_v5, 0  ;;  %vm340_vm4 = vcmp.ne.s32.totalorder %v320_v5, 15 }
  0x14   : > { %v1321_v8 = vsel %vm334_vm2, 1.0, %v1239_v6  ;;  %v1327_v10 = vsel %vm340_vm4, 1.0, %v1239_v6  ;;  %vm488_vm2 = vcmask 908288   ;;  %vm521_vm4 = vcmask 900096  }
  0x15   : > { %v366_v11 = vrot.slane %v1321_v8, 4  ;;  %v407_v12 = vrot.slane %v1327_v10, 4 }
  0x17   : > { %v368_v13 = vsel %vm367_vm3, %v1318_v7, %v366_v11  ;;  %v408_v14 = vsel %vm367_vm3, %v1324_v9, %v407_v12 }
  0x18   : > { %441 = vrot.lane.b32.xlu1 %v368_v13, %s1240_s12  ;;  %530 = vrot.lane.b32.xlu2 %v368_v13, %s1241_s13 }
  0x19   : > { %409 = vrot.lane.b32.xlu0 %v408_v14, %s1242_s14 }
  0x20   : > { %497 = vrot.lane.b32.xlu1 %v408_v14, %s1243_s15  ;;  %586 = vrot.lane.b32.xlu2 %v408_v14, %s1244_s16 }
  0x72   : > { %v531_v48 = vpop.permute.xlu2 %530 }
  0x73   : > { %v532_v49 = vrot.slane %v531_v48, 4 }
  0x75   : > { %v534_v59 = vsel %vm533_vm14, %v532_v49, %v531_v48  ;;  %v1253_v48 = vmov 0  }
  0x76   : > { %1162 = vset.pattern.permute.xlu0 %v1253_v48  ;;  %1163 = vset.pattern.permute.xlu1 %v1253_v48 }
  0x77   : > { %1229 = vset.pattern.permute.xlu2 %v1253_v48 }
  0x7a   : > { %v587_v60 = vpop.permute.xlu2 %586 }
  0x7b   : > { %v588_v1 = vrot.slane %v587_v60, 4 }
  0x7d   : > { %v590_v14 = vsel %vm589_vm15, %v588_v1, %v587_v60 }
  0x81   : > { %v352_v15 = vpop.permute.xlu0 %351 }
  0x82   : > { %v353_v16 = vrot.slane %v352_v15, 4 }
  0x84   : > { %v355_v17 = vsel %vm354_vm7, %v353_v16, %v352_v15  ;;  %362 = vst.msk [vmem:[#allocation2 + $0x8] sm:$0xf] %vm346_vm5, %v353_v16  ;;  %vm553_vm5 = vcmask 785408  }
  0x85   : > { %361 = vst.msk [vmem:[#allocation2] sm:$0xff] %vm360_vm10, %v355_v17  ;;  %vm633_vm10 = vcmask 293888  }
  0x8a   : > { %v442_v26 = vpop.permute.xlu1 %441 }
  0x8b   : > { %v380_v18 = vld [vmem:[#allocation2 + $0x8] sm:$0xf]  ;;  %v410_v19 = vpop.permute.xlu0 %409  ;;  %v443_v28 = vrot.slane %v442_v26, 4 }
  0x8c   : > { %v1345_v20 = vld [vmem:[#allocation2] sm:$0xff]  ;;  %386 = vst [vmem:[#allocation1 + $0x11] ss:$2 sm:$0xff] %v380_v18  ;;  %v411_v22 = vrot.slane %v410_v19, 4  ;;  %v404_v23 = vld [vmem:[#allocation2 + $0x8] sm:$0xf] }
  0x8d   : > { %v370_v21 = vmul.f32 %v1345_v20, %v368_v13  ;;  %v440_v27 = vld [vmem:[#allocation2 + $0x8] sm:$0xf]  ;;  %v445_v37 = vsel %vm444_vm12, %v443_v28, %v442_v26  ;;  %v537_v63 = vmul.f32 %v534_v59, %v1345_v20  ;;  %v593_v16 = vmul.f32 %v590_v14, %v1345_v20 }
  0x8e   : > { %v417_v24 = vmul.f32 %v411_v22, %v404_v23  ;;  %v449_v31 = vmul.f32 %v443_v28, %v440_v27  ;;  %v413_v32 = vsel %vm412_vm11, %v411_v22, %v410_v19  ;;  %v473_v40 = vld [vmem:[#allocation2 + $0x8] sm:$0xf]  ;;  %v448_v41 = vmul.f32 %v445_v37, %v1345_v20 }
  0x8f   : > { %372 = vst [vmem:[#allocation1] ss:$2 sm:$0xff] %v370_v21  ;;  %v416_v34 = vmul.f32 %v413_v32, %v1345_v20  ;;  %v496_v45 = vld [vmem:[#allocation2 + $0x8] sm:$0xf]  ;;  %v1184_v59 = vpack.i.bf16 %v1327_v10, %v1324_v9 }
  0x90   : > { %v529_v50 = vld [vmem:[#allocation2 + $0x8] sm:$0xf] }
  0x91   : > { %v538_v53 = vmul.f32 %v532_v49, %v529_v50  ;;  %v561_v62 = vld [vmem:[#allocation2 + $0x8] sm:$0xf] }
  0x92   : > { %v498_v38 = vpop.permute.xlu1 %497  ;;  %v585_v0 = vld [vmem:[#allocation2 + $0x8] sm:$0xf] }
  0x93   : > { %v1348_v25 = vld.sshfl [vmem:[#allocation1 + $0x10] sm:$0xff pattern:$0x75316420]  ;;  %v499_v42 = vrot.slane %v498_v38, 4  ;;  %v594_v5 = vmul.f32 %v588_v1, %v585_v0 }
  0x94   : > { %422 = vst [vmem:[#allocation1 + $0x10] ss:$2 sm:$0xff] %v417_v24 }
  0x95   : > { %v505_v46 = vmul.f32 %v499_v42, %v496_v45  ;;  %v501_v54 = vsel %vm500_vm13, %v499_v42, %v498_v38 }
  0x96   : > { %v373_v29 = vld.sshfl [vmem:[#allocation1] sm:$0xff pattern:$0x75316420]  ;;  %v374_v30 = vld.sshfl [vmem:[#allocation1 + $0x8] sm:$0xff pattern:$0x75316420]  ;;  %v504_v56 = vmul.f32 %v501_v54, %v1345_v20 }
  0x97   : > { %384 = vst [vmem:[#allocation1 + $0x1] ss:$2 sm:$0xff] %v1345_v20 }
  0x98   : > { %377 = vst [vmem:[#allocation4 + $0x30] sm:$0xf] %v373_v29 }
  0x99   : > { %378 = vst [vmem:[#allocation4] sm:$0xf] %v374_v30 }
  0x9b   : > { %v425_v33 = vld.sshfl [vmem:[#allocation1 + $0x10] sm:$0xff pattern:$0x75316420] }
  0x9c   : > { %430 = vrot.lane.b32.xlu2 %v425_v33, %s1245_s17  ;;  %455 = vst [vmem:[#allocation1 + $0x11] ss:$2 sm:$0xff] %v449_v31 }
  0x9e   : > { %v1354_v35 = vld.sshfl [vmem:[#allocation1] sm:$0xff pattern:$0x75316420]  ;;  %v1356_v36 = vld.sshfl [vmem:[#allocation1 + $0x8] sm:$0xff pattern:$0x75316420] }
  0x9f   : > { %420 = vst [vmem:[#allocation1] ss:$2 sm:$0xff] %v416_v34 }
  0xa3   : > { %v458_v39 = vld.sshfl [vmem:[#allocation1 + $0x10] sm:$0xff pattern:$0x75316420] }
  0xa4   : > { %463 = vrot.lane.b32.xlu2 %v458_v39, %s1246_s18  ;;  %478 = vst [vmem:[#allocation1 + $0x10] ss:$2 sm:$0xff] %v473_v40 }
  0xa6   : > { %v424_v43 = vld.sshfl [vmem:[#allocation1 + $0x8] sm:$0xff pattern:$0x75316420]  ;;  %v423_v44 = vld.sshfl [vmem:[#allocation1] sm:$0xff pattern:$0x75316420] }
  0xa7   : > { %428 = vrot.lane.b32.xlu1 %v424_v43, %s1245_s17  ;;  %426 = vrot.lane.b32.xlu0 %v423_v44, %s1245_s17  ;;  %453 = vst [vmem:[#allocation1 + $0x1] ss:$2 sm:$0xff] %v448_v41 }
  0xab   : > { %v481_v47 = vld.sshfl [vmem:[#allocation1 + $0x10] sm:$0xff pattern:$0x75316420] }
  0xac   : > { %486 = vrot.lane.b32.xlu2 %v481_v47, %s1247_s19  ;;  %511 = vst [vmem:[#allocation1 + $0x11] ss:$2 sm:$0xff] %v505_v46  ;;  %v627_v46 = vld [vmem:[%s1520_s2] sm:$0xff] }
  0xad   : > { %v685_v47 = vld [vmem:[%s1521_s3] sm:$0xff] }
  0xae   : > { %v457_v51 = vld.sshfl [vmem:[#allocation1 + $0x8] sm:$0xff pattern:$0x75316420]  ;;  %v456_v52 = vld.sshfl [vmem:[#allocation1] sm:$0xff pattern:$0x75316420] }
  0xaf   : > { %461 = vrot.lane.b32.xlu1 %v457_v51, %s1246_s18  ;;  %459 = vrot.lane.b32.xlu0 %v456_v52, %s1246_s18  ;;  %476 = vst [vmem:[#allocation1] ss:$2 sm:$0xff] %v1345_v20 }
  0xb3   : > { %v514_v55 = vld.sshfl [vmem:[#allocation1 + $0x10] sm:$0xff pattern:$0x75316420] }
  0xb4   : > { %519 = vrot.lane.b32.xlu2 %v514_v55, %s1248_s20  ;;  %543 = vst [vmem:[#allocation1 + $0x10] ss:$2 sm:$0xff] %v538_v53  ;;  %v1415_v53 = vpack.i.bf16 %v1321_v8, %v1318_v7 }
  0xb6   : > { %v480_v57 = vld.sshfl [vmem:[#allocation1 + $0x8] sm:$0xff pattern:$0x75316420]  ;;  %v479_v58 = vld.sshfl [vmem:[#allocation1] sm:$0xff pattern:$0x75316420] }
  0xb7   : > { %484 = vrot.lane.b32.xlu1 %v480_v57, %s1247_s19  ;;  %482 = vrot.lane.b32.xlu0 %v479_v58, %s1247_s19  ;;  %509 = vst [vmem:[#allocation1 + $0x1] ss:$2 sm:$0xff] %v504_v56 }
  0xbb   : > { %v546_v61 = vld.sshfl [vmem:[#allocation1 + $0x10] sm:$0xff pattern:$0x75316420] }
  0xbc   : > { %551 = vrot.lane.b32.xlu2 %v546_v61, %s1249_s21  ;;  %567 = vst [vmem:[#allocation1 + $0x11] ss:$2 sm:$0xff] %v561_v62 }
  0xbe   : > { %v513_v2 = vld.sshfl [vmem:[#allocation1 + $0x8] sm:$0xff pattern:$0x75316420]  ;;  %v512_v3 = vld.sshfl [vmem:[#allocation1] sm:$0xff pattern:$0x75316420] }
  0xbf   : > { %517 = vrot.lane.b32.xlu1 %v513_v2, %s1248_s20  ;;  %515 = vrot.lane.b32.xlu0 %v512_v3, %s1248_s20  ;;  %541 = vst [vmem:[#allocation1] ss:$2 sm:$0xff] %v537_v63 }
  0xc3   : > { %v570_v11 = vld.sshfl [vmem:[#allocation1 + $0x10] sm:$0xff pattern:$0x75316420] }
  0xc4   : > { %575 = vrot.lane.b32.xlu2 %v570_v11, %s1250_s22  ;;  %599 = vst [vmem:[#allocation1 + $0x10] ss:$2 sm:$0xff] %v594_v5 }
  0xc6   : > { %v545_v12 = vld.sshfl [vmem:[#allocation1 + $0x8] sm:$0xff pattern:$0x75316420]  ;;  %v544_v13 = vld.sshfl [vmem:[#allocation1] sm:$0xff pattern:$0x75316420] }
  0xc7   : > { %549 = vrot.lane.b32.xlu1 %v545_v12, %s1249_s21  ;;  %547 = vrot.lane.b32.xlu0 %v544_v13, %s1249_s21  ;;  %565 = vst [vmem:[#allocation1 + $0x1] ss:$2 sm:$0xff] %v1345_v20  ;;  %v616_v13 = vld [vmem:[%s1519_s1] sm:$0xff] }
  0xcb   : > { %v602_v15 = vld.sshfl [vmem:[#allocation1 + $0x10] sm:$0xff pattern:$0x75316420] }
  0xcc   : > { %607 = vrot.lane.b32.xlu2 %v602_v15, %s1251_s23 }
  0xce   : > { %v569_v17 = vld.sshfl [vmem:[#allocation1 + $0x8] sm:$0xff pattern:$0x75316420]  ;;  %v568_v18 = vld.sshfl [vmem:[#allocation1] sm:$0xff pattern:$0x75316420] }
  0xcf   : > { %573 = vrot.lane.b32.xlu1 %v569_v17, %s1250_s22  ;;  %571 = vrot.lane.b32.xlu0 %v568_v18, %s1250_s22  ;;  %597 = vst [vmem:[#allocation1] ss:$2 sm:$0xff] %v593_v16 }
  0xd4   : > { %394 = vrot.lane.b32.xlu2 %v1348_v25, %s1252_s24 }
  0xd6   : > { %v601_v19 = vld.sshfl [vmem:[#allocation1 + $0x8] sm:$0xff pattern:$0x75316420]  ;;  %v600_v21 = vld.sshfl [vmem:[#allocation1] sm:$0xff pattern:$0x75316420] }
  0xd7   : > { %605 = vrot.lane.b32.xlu1 %v601_v19, %s1251_s23  ;;  %603 = vrot.lane.b32.xlu0 %v600_v21, %s1251_s23  ;;  %995 = vst [vmem:[#allocation1] ss:$2 sm:$0xff] %v1313_v4 }
  0xde   : > { %v997_v16 = vld.sshfl [vmem:[#allocation1 + $0x8] sm:$0xff pattern:$0x75316420]  ;;  %v996_v17 = vld.sshfl [vmem:[#allocation1] sm:$0xff pattern:$0x75316420] }
  0xdf   : > { %392 = vrot.lane.b32.xlu1 %v1356_v36, %s1252_s24  ;;  %390 = vrot.lane.b32.xlu0 %v1354_v35, %s1252_s24 }
  0xe7   : > { %630 = vperm.xlu0 %1162, %v627_v46   ;;  %688 = vperm.xlu1 %1163, %v685_v47  }
  0xef   : > { %1170 = vrot.lane.b32.xlu0 %v1415_v53, %s1241_s13 }
  0xf6   : > { %v431_v20 = vpop.permute.xlu2 %430 }
  0xf7   : > { %1185 = vrot.lane.b32.xlu0 %v1184_v59, %s1242_s14 }
  0xfe   : > { %v464_v22 = vpop.permute.xlu2 %463 }
 0x106   : > { %v487_v27 = vpop.permute.xlu2 %486 }
 0x10e   : > { %v520_v31 = vpop.permute.xlu2 %519 }
 0x116   : > { %v552_v38 = vpop.permute.xlu2 %551 }
 0x119   : > { %v429_v23 = vpop.permute.xlu1 %428  ;;  %v427_v24 = vpop.permute.xlu0 %426 }
 0x11a   : > { %v434_v25 = vsel %vm1528_vm0, %v429_v23, %v431_v20  ;;  %v433_v26 = vsel %vm1528_vm0, %v427_v24, %v429_v23 }
 0x11b   : > { %438 = vst [vmem:[#allocation4 + $0x10] sm:$0xf] %v434_v25 }
 0x11c   : > { %437 = vst [vmem:[#allocation4 + $0x18] sm:$0xf] %v433_v26 }
 0x11e   : > { %v576_v45 = vpop.permute.xlu2 %575 }
 0x121   : > { %v462_v4 = vpop.permute.xlu1 %461  ;;  %v460_v28 = vpop.permute.xlu0 %459 }
 0x122   : > { %v467_v29 = vsel %vm465_vm1, %v462_v4, %v464_v22  ;;  %v466_v30 = vsel %vm465_vm1, %v460_v28, %v462_v4 }
 0x123   : > { %471 = vst [vmem:[#allocation4 + $0x10] sm:$0xf0] %v467_v29 }
 0x124   : > { %470 = vst [vmem:[#allocation4 + $0x18] sm:$0xf0] %v466_v30 }
 0x126   : > { %v608_v54 = vpop.permute.xlu2 %607 }
 0x129   : > { %v485_v32 = vpop.permute.xlu1 %484  ;;  %v483_v33 = vpop.permute.xlu0 %482 }
 0x12a   : > { %v490_v34 = vsel %vm488_vm2, %v485_v32, %v487_v27  ;;  %v489_v35 = vsel %vm488_vm2, %v483_v33, %v485_v32  ;;  %v620_v11 = vld [vmem:[#allocation4 + $0x10] sm:$0xff] }
 0x12b   : > { %494 = vst [vmem:[#allocation4 + $0x28] sm:$0xf] %v490_v34  ;;  %v619_v12 = vld [vmem:[#allocation4 + $0x18] sm:$0xff] }
 0x12c   : > { %493 = vst [vmem:[#allocation4 + $0x48] sm:$0xf] %v489_v35  ;;  %v986_v32 = vld [vmem:[%s1524_s6] sm:$0xff] }
 0x12e   : > { %v395_v60 = vpop.permute.xlu2 %394 }
 0x131   : > { %v518_v36 = vpop.permute.xlu1 %517  ;;  %v516_v37 = vpop.permute.xlu0 %515 }
 0x132   : > { %v523_v39 = vsel %vm521_vm4, %v518_v36, %v520_v31  ;;  %v522_v40 = vsel %vm521_vm4, %v516_v37, %v518_v36 }
 0x133   : > { %527 = vst [vmem:[#allocation4 + $0x28] sm:$0xf0] %v523_v39 }
 0x134   : > { %526 = vst [vmem:[#allocation4 + $0x48] sm:$0xf0] %v522_v40 }
 0x139   : > { %v550_v41 = vpop.permute.xlu1 %549  ;;  %v548_v42 = vpop.permute.xlu0 %547 }
 0x13a   : > { %v555_v43 = vsel %vm553_vm5, %v550_v41, %v552_v38  ;;  %v554_v44 = vsel %vm553_vm5, %v548_v42, %v550_v41  ;;  %v622_v10 = vld [vmem:[#allocation4 + $0x28] sm:$0xff] }
 0x13b   : > { %559 = vst [vmem:[#allocation4 + $0x20] sm:$0xf] %v555_v43  ;;  %v621_v5 = vld [vmem:[#allocation4 + $0x48] sm:$0xff] }
 0x13c   : > { %558 = vst [vmem:[#allocation4 + $0x8] sm:$0xf] %v554_v44 }
 0x141   : > { %v574_v49 = vpop.permute.xlu1 %573  ;;  %v572_v50 = vpop.permute.xlu0 %571 }
 0x142   : > { %v579_v51 = vsel %vm577_vm6, %v574_v49, %v576_v45  ;;  %v578_v52 = vsel %vm577_vm6, %v572_v50, %v574_v49 }
 0x143   : > { %583 = vst [vmem:[#allocation4 + $0x20] sm:$0xf0] %v579_v51 }
 0x144   : > { %582 = vst [vmem:[#allocation4 + $0x8] sm:$0xf0] %v578_v52 }
 0x149   : > { %v606_v55 = vpop.permute.xlu1 %605  ;;  %v604_v56 = vpop.permute.xlu0 %603 }
 0x14a   : > { %v611_v57 = vsel %vm609_vm8, %v606_v55, %v608_v54  ;;  %v610_v58 = vsel %vm609_vm8, %v604_v56, %v606_v55  ;;  %v624_v3 = vld [vmem:[#allocation4 + $0x20] sm:$0xff] }
 0x14b   : > { %615 = vst [vmem:[#allocation4 + $0x38] sm:$0xf] %v611_v57  ;;  %v623_v9 = vld [vmem:[#allocation4 + $0x8] sm:$0xff] }
 0x14c   : > { %614 = vst [vmem:[#allocation4 + $0x40] sm:$0xf] %v610_v58 }
 0x151   : > { %v393_v61 = vpop.permute.xlu1 %392  ;;  %v391_v62 = vpop.permute.xlu0 %390 }
 0x152   : > { %v398_v63 = vsel %vm1527_vm9, %v393_v61, %v395_v60  ;;  %v397_v0 = vsel %vm1527_vm9, %v391_v62, %v393_v61  ;;  %v626_v1 = vld [vmem:[#allocation4 + $0x38] sm:$0xf] }
 0x153   : > { %402 = vst [vmem:[#allocation4] sm:$0xf0] %v398_v63  ;;  %v625_v2 = vld [vmem:[#allocation4 + $0x40] sm:$0xf]  ;;  %1126 = vmatpush.msk.msra.mxu1 %vm367_vm3, %v626_v1 }
 0x154   : > { %401 = vst [vmem:[#allocation4 + $0x30] sm:$0xf0] %v397_v0  ;;  %1124 = vmatpush.msk.msra.mxu0 %vm367_vm3, %v625_v2 }
 0x155   : > { %675 = vmatpush.msra.mxu1 %v624_v3 }
 0x156   : > { %655 = vmatpush.msra.mxu0 %v623_v9 }
 0x157   : > { %676 = vmatpush.msra.mxu1 %v622_v10 }
 0x158   : > { %656 = vmatpush.msra.mxu0 %v621_v5 }
 0x159   : > { %677 = vmatpush.msra.mxu1 %v620_v11  ;;  %v631_v18 = vpop.permute.xlu0 %630  ;;  %v689_v21 = vpop.permute.xlu1 %688 }
 0x15a   : > { %657 = vmatpush.msra.mxu0 %v619_v12  ;;  %v618_v14 = vld [vmem:[#allocation4] sm:$0xff] }
 0x15b   : > { %v617_v15 = vld [vmem:[#allocation4 + $0x30] sm:$0xff]  ;;  %678 = vmatpush.msra.mxu1 %v618_v14 }
 0x15c   : > { %658 = vmatpush.msra.mxu0 %v617_v15  ;;  %1127 = vmatmul.msk.f32.vlgmr.msra.gmra.mxu1 %vm633_vm10, %v616_v13 }
 0x15d   : > { %1125 = vmatmul.msk.f32.vlgmr.msra.gmra.mxu0 %vm633_vm10, %v616_v13  ;;  %1132 = vmatpush.msk.msrb.mxu1 %vm367_vm3, %v997_v16  ;;  %vm708_vm10 = vcmask 1047688   ;;  %v988_v13 = vld [vmem:[%s1525_s7] sm:$0xff] }
 0x15e   : > { %1130 = vmatpush.msk.msrb.mxu0 %vm367_vm3, %v996_v17  ;;  %vm696_vm3 = vcmask 277640  }
 0x15f   : > { %697 = vst.msk [vmem:[#allocation3 + $0x10] sm:$0xff] %vm696_vm3, %v1239_v6 }
 0x161   : > { %v1171_v37 = vpop.permute.xlu0 %1170 }
 0x162   : > { %v1173_v39 = vunpack.i.h.bf16 %v1171_v37  ;;  %v1172_v41 = vunpack.i.l.bf16 %v1171_v37 }
 0x164   : > { %v848_v44 = vsel %vm533_vm14, %v1172_v41, %v1173_v39 }
 0x1d9   : > { %v680_v19 = vpop.f32.mrf.mxu1 }
 0x1da   : > { %v660_v20 = vpop.f32.mrf.mxu0  ;;  %v681_v22 = vadd.f32 %v680_v19, %v631_v18 }
 0x1db   : > { %v661_v23 = vadd.f32 %v660_v20, %v631_v18  ;;  %v936_v20 = vld [vmem:[%s1523_s5] sm:$0xff] }
 0x1dc   : > { %v692_v24 = vmul.f32 %v689_v21, %v681_v22  ;;  %vm684_vm9 = vcmp.gt.f32.partialorder %v681_v22, 0.0 }
 0x1dd   : > { %v691_v25 = vmul.f32 %v689_v21, %v661_v23  ;;  %vm683_vm0 = vcmp.gt.f32.partialorder %v661_v23, 0.0 }
 0x1de   : > { %v694_v26 = vsel %vm684_vm9, %v681_v22, %v692_v24 }
 0x1df   : > { %702 = vrot.lane.b32.xlu1 %v694_v26, %s1238_s11  ;;  %v693_v27 = vsel %vm683_vm0, %v661_v23, %v691_v25  ;;  %vm998_vm0 = vcmask 31744  }
 0x1e0   : > { %700 = vrot.lane.b32.xlu2 %v693_v27, %s1238_s11  ;;  %1131 = vmatmul.msk.f32.vlgmr.msrb.gmra.mxu0 %vm998_vm0, %v986_v32 }
 0x1e1   : > { %1133 = vmatmul.msk.f32.vlgmr.msrb.gmra.mxu1 %vm998_vm0, %v986_v32 }
 0x1e7   : > { %1175 = vrot.lane.b32.xlu1 %v1184_v59, %s1243_s15 }
 0x1e8   : > { %1165 = vrot.lane.b32.xlu2 %v1184_v59, %s1244_s16  ;;  %v1186_v59 = vpop.permute.xlu0 %1185 }
 0x1e9   : > { %v1188_v62 = vunpack.i.h.bf16 %v1186_v59  ;;  %v1187_v0 = vunpack.i.l.bf16 %v1186_v59 }
 0x1eb   : > { %v743_v3 = vsel %vm412_vm11, %v1187_v0, %v1188_v62 }
 0x1f0   : > { %1180 = vrot.lane.b32.xlu2 %v1415_v53, %s1240_s12 }
 0x23a   : > { %v701_v4 = vpop.permute.xlu2 %700 }
 0x23b   : > { %709 = vst.msk [vmem:[#allocation3] sm:$0xff] %vm708_vm10, %v701_v4 }
 0x242   : > { %v1440_v29 = vld [vmem:[#allocation3] sm:$0xff]  ;;  %v1166_v6 = vpop.permute.xlu2 %1165 }
 0x243   : > { %v1168_v33 = vunpack.i.h.bf16 %v1166_v6  ;;  %v1167_v40 = vunpack.i.l.bf16 %v1166_v6  ;;  %v852_v53 = vmul.f32 %v1172_v41, %v1440_v29  ;;  %v747_v5 = vmul.f32 %v1187_v0, %v1440_v29 }
 0x245   : > { %v895_v42 = vsel %vm589_vm15, %v1167_v40, %v1168_v33  ;;  %v899_v48 = vmul.f32 %v1167_v40, %v1440_v29 }
 0x24a   : > { %v1181_v49 = vpop.permute.xlu2 %1180 }
 0x24b   : > { %v1183_v51 = vunpack.i.h.bf16 %v1181_v49  ;;  %v1182_v54 = vunpack.i.l.bf16 %v1181_v49 }
 0x24d   : > { %v772_v57 = vsel %vm444_vm12, %v1182_v54, %v1183_v51  ;;  %v776_v1 = vmul.f32 %v1182_v54, %v1440_v29  ;;  %vm1531_vm12 = vcmask 1039360  }
 0x24e   : > { %vm1532_vm14 = vmmov %vm1531_vm12 }
 0x251   : > { %v703_v28 = vpop.permute.xlu1 %702 }
 0x252   : > { %v1443_v30 = vsel %vm354_vm7, %v701_v4, %v703_v28  ;;  %711 = vst.msk [vmem:[#allocation3 + $0x10] sm:$0xff] %vm354_vm7, %v703_v28  ;;  %vm1529_vm7 = vcmask 1031168  }
 0x253   : > { %v1189_v31 = vpack.i.bf16 %v1443_v30, %v1440_v29  ;;  %v900_v46 = vmul.f32 %v895_v42, %v1443_v30  ;;  %v853_v50 = vmul.f32 %v848_v44, %v1443_v30  ;;  %v777_v63 = vmul.f32 %v772_v57, %v1443_v30  ;;  %vm1530_vm11 = vmmov %vm1529_vm7 }
 0x254   : > { %v748_v10 = vmul.f32 %v743_v3, %v1443_v30 }
 0x255   : > { %1190 = vrot.lane.b32.xlu0 %v1189_v31, %s1250_s22  ;;  %v1199_v52 = vpack.i.bf16 %v900_v46, %v899_v48  ;;  %v1204_v56 = vpack.i.bf16 %v853_v50, %v852_v53  ;;  %v1214_v9 = vpack.i.bf16 %v777_v63, %v776_v1  ;;  %v715_v1 = vmul.f32 %v1321_v8, %v1443_v30 }
 0x256   : > { %v1224_v11 = vpack.i.bf16 %v748_v10, %v747_v5 }
 0x259   : > { %v814_v34 = vld [vmem:[#allocation3 + $0x10] sm:$0xff]  ;;  %v1176_v36 = vpop.permute.xlu1 %1175 }
 0x25a   : > { %880 = vrot.lane.b32.xlu1 %v814_v34, %s1250_s22  ;;  %v901_v35 = vmul.f32 %v1168_v33, %v814_v34  ;;  %v1178_v38 = vunpack.i.h.bf16 %v1176_v36  ;;  %v854_v45 = vmul.f32 %v1173_v39, %v814_v34  ;;  %v1177_v47 = vunpack.i.l.bf16 %v1176_v36 }
 0x25b   : > { %v778_v58 = vmul.f32 %v1183_v51, %v814_v34  ;;  %v749_v12 = vmul.f32 %v1188_v62, %v814_v34  ;;  %v917_v62 = vld [vmem:[%s1522_s4] sm:$0xff] }
 0x25c   : > { %909 = vrot.lane.b32.xlu2 %v901_v35, %s1251_s23  ;;  %v825_v43 = vmul.f32 %v1178_v38, %v814_v34  ;;  %v819_v55 = vsel %vm500_vm13, %v1177_v47, %v1178_v38  ;;  %v823_v60 = vmul.f32 %v1177_v47, %v1440_v29  ;;  %vm942_vm13 = vcmask 588800  }
 0x25d   : > { %1195 = vrot.lane.b32.xlu0 %v1189_v31, %s1247_s19  ;;  %v824_v61 = vmul.f32 %v819_v55, %v1443_v30 }
 0x25e   : > { %v1043_v5 = vpop.f32.mrf.mxu1 }
 0x25f   : > { %v1209_v2 = vpack.i.bf16 %v824_v61, %v823_v60  ;;  %v714_v61 = vmul.f32 %v1318_v7, %v1440_v29 }
 0x262   : > { %804 = vrot.lane.b32.xlu1 %v814_v34, %s1247_s19  ;;  %s1137_s19 = sshll.u32 %s1534_s28, 4 }
 0x263   : > { %s305_s22 = scalar_lea.vmem %s1526_s8, %s1137_s19 }
 0x264   : > { %833 = vrot.lane.b32.xlu2 %v825_v43, %s1248_s20 }
 0x265   : > { %862 = vrot.lane.b32.xlu0 %v854_v45, %s1249_s21 }
 0x26a   : > { %1200 = vrot.lane.b32.xlu1 %v1199_v52, %s1251_s23 }
 0x26c   : > { %1205 = vrot.lane.b32.xlu2 %v1204_v56, %s1249_s21 }
 0x26d   : > { %786 = vrot.lane.b32.xlu0 %v778_v58, %s1246_s18 }
 0x272   : > { %1210 = vrot.lane.b32.xlu1 %v1209_v2, %s1248_s20  ;;  %v1023_v2 = vpop.f32.mrf.mxu0 }
 0x274   : > { %1215 = vrot.lane.b32.xlu2 %v1214_v9, %s1246_s18 }
 0x275   : > { %1220 = vrot.lane.b32.xlu0 %v1189_v31, %s1252_s24 }
 0x27a   : > { %1225 = vrot.lane.b32.xlu1 %v1224_v11, %s1245_s17 }
 0x27c   : > { %757 = vrot.lane.b32.xlu2 %v749_v12, %s1245_s17 }
 0x27d   : > { %991 = vperm.xlu0 %1162, %v988_v13  }
 0x282   : > { %728 = vrot.lane.b32.xlu1 %v814_v34, %s1252_s24 }
 0x284   : > { %939 = vperm.xlu2 %1229, %v936_v20  }
 0x2b6   : > { %v910_v14 = vpop.permute.xlu2 %909 }
 0x2be   : > { %v834_v18 = vpop.permute.xlu2 %833 }
 0x2c6   : > { %v1206_v22 = vpop.permute.xlu2 %1205 }
 0x2c7   : > { %v1191_v15 = vpop.permute.xlu0 %1190  ;;  %v1208_v4 = vunpack.i.h.bf16 %v1206_v22  ;;  %v1207_v28 = vunpack.i.l.bf16 %v1206_v22 }
 0x2c8   : > { %v1193_v24 = vunpack.i.h.bf16 %v1191_v15  ;;  %v1192_v25 = vunpack.i.l.bf16 %v1191_v15 }
 0x2c9   : > { %v864_v35 = vsel %vm553_vm5, %v1207_v28, %v1208_v4 }
 0x2ca   : > { %v882_v33 = vsel %vm577_vm6, %v1192_v25, %v1193_v24 }
 0x2cc   : > { %v881_v16 = vpop.permute.xlu1 %880 }
 0x2cd   : > { %v883_v34 = vsel %vm577_vm6, %v1193_v24, %v881_v16 }
 0x2ce   : > { %v1216_v37 = vpop.permute.xlu2 %1215 }
 0x2cf   : > { %v1196_v17 = vpop.permute.xlu0 %1195  ;;  %v1218_v43 = vunpack.i.h.bf16 %v1216_v37  ;;  %v1217_v44 = vunpack.i.l.bf16 %v1216_v37 }
 0x2d0   : > { %v1198_v39 = vunpack.i.h.bf16 %v1196_v17  ;;  %v1197_v40 = vunpack.i.l.bf16 %v1196_v17 }
 0x2d1   : > { %v788_v50 = vsel %vm465_vm1, %v1217_v44, %v1218_v43 }
 0x2d2   : > { %v806_v47 = vsel %vm488_vm2, %v1197_v40, %v1198_v39 }
 0x2d4   : > { %v805_v19 = vpop.permute.xlu1 %804 }
 0x2d5   : > { %v807_v48 = vsel %vm488_vm2, %v1198_v39, %v805_v19 }
 0x2d6   : > { %v758_v57 = vpop.permute.xlu2 %757 }
 0x2d7   : > { %v863_v21 = vpop.permute.xlu0 %862 }
 0x2d8   : > { %v865_v36 = vsel %vm553_vm5, %v1208_v4, %v863_v21 }
 0x2dc   : > { %v1201_v23 = vpop.permute.xlu1 %1200 }
 0x2dd   : > { %v1203_v26 = vunpack.i.h.bf16 %v1201_v23  ;;  %v1202_v27 = vunpack.i.l.bf16 %v1201_v23 }
 0x2de   : > { %v940_v7 = vpop.permute.xlu2 %939 }
 0x2df   : > { %v911_v31 = vsel %vm609_vm8, %v1202_v27, %v1203_v26  ;;  %v912_v32 = vsel %vm609_vm8, %v1203_v26, %v910_v14  ;;  %v787_v6 = vpop.permute.xlu0 %786 }
 0x2e0   : > { %953 = vmatpush.msra.mxu2 %v911_v31  ;;  %973 = vmatpush.msra.mxu3 %v912_v32  ;;  %v789_v51 = vsel %vm465_vm1, %v1218_v43, %v787_v6 }
 0x2e2   : > { %954 = vmatpush.msra.mxu2 %v882_v33  ;;  %974 = vmatpush.msra.mxu3 %v883_v34 }
 0x2e4   : > { %v1211_v38 = vpop.permute.xlu1 %1210  ;;  %955 = vmatpush.msra.mxu2 %v864_v35  ;;  %975 = vmatpush.msra.mxu3 %v865_v36 }
 0x2e5   : > { %v1213_v41 = vunpack.i.h.bf16 %v1211_v38  ;;  %v1212_v42 = vunpack.i.l.bf16 %v1211_v38 }
 0x2e7   : > { %v835_v45 = vsel %vm521_vm4, %v1212_v42, %v1213_v41  ;;  %v836_v46 = vsel %vm521_vm4, %v1213_v41, %v834_v18  ;;  %v1221_v49 = vpop.permute.xlu0 %1220 }
 0x2e8   : > { %956 = vmatpush.msra.mxu2 %v835_v45  ;;  %976 = vmatpush.msra.mxu3 %v836_v46  ;;  %v1223_v55 = vunpack.i.h.bf16 %v1221_v49  ;;  %v1222_v56 = vunpack.i.l.bf16 %v1221_v49 }
 0x2ea   : > { %957 = vmatpush.msra.mxu2 %v806_v47  ;;  %977 = vmatpush.msra.mxu3 %v807_v48  ;;  %v730_v60 = vsel %vm1531_vm12, %v1222_v56, %v1223_v55 }
 0x2ec   : > { %v1226_v52 = vpop.permute.xlu1 %1225  ;;  %958 = vmatpush.msra.mxu2 %v788_v50  ;;  %978 = vmatpush.msra.mxu3 %v789_v51 }
 0x2ed   : > { %v1228_v53 = vunpack.i.h.bf16 %v1226_v52  ;;  %v1227_v54 = vunpack.i.l.bf16 %v1226_v52 }
 0x2ef   : > { %v759_v58 = vsel %vm1529_vm7, %v1227_v54, %v1228_v53  ;;  %v760_v59 = vsel %vm1530_vm11, %v1228_v53, %v758_v57  ;;  %v992_v3 = vpop.permute.xlu0 %991 }
 0x2f0   : > { %959 = vmatpush.msra.mxu2 %v759_v58  ;;  %979 = vmatpush.msra.mxu3 %v760_v59  ;;  %v1024_v9 = vadd.f32 %v1023_v2, %v992_v3  ;;  %v1044_v13 = vadd.f32 %v1043_v5, %v992_v3 }
 0x2f2   : > { %960 = vmatpush.msra.mxu2 %v730_v60 }
 0x2f4   : > { %v729_v63 = vpop.permute.xlu1 %728  ;;  %961 = vmatpush.msra.mxu2 %v714_v61 }
 0x2f5   : > { %1128 = vmatmul.msk.f32.vlgmr.msra.gmra.mxu2 %vm942_vm13, %v917_v62  ;;  %v731_v0 = vsel %vm1532_vm14, %v1223_v55, %v729_v63 }
 0x2f6   : > { %980 = vmatpush.msra.mxu3 %v731_v0 }
 0x2f8   : > { %981 = vmatpush.msra.mxu3 %v715_v1 }
 0x2f9   : > { %1129 = vmatmul.msk.f32.vlgmr.msra.gmra.mxu3 %vm942_vm13, %v917_v62 }
 0x378   : > { %v963_v29 = vpop.f32.mrf.mxu2 }
 0x379   : > { %v964_v10 = vadd.f32 %v963_v29, %v940_v7 }
 0x37b   : > { %v1046_v11 = vadd.f32 %v1024_v9, %v964_v10 }
 0x37c   : > { %v983_v12 = vpop.f32.mrf.mxu3 }
 0x37d   : > { %vm1048_vm15 = vcmp.gt.f32.partialorder %v1046_v11, 0.0  ;;  %v1050_v14 = vmul.f32 0.2, %v1046_v11  ;;  %v984_v8 = vadd.f32 %v983_v12, %v940_v7 }
 0x37f   : > { %v1052_v30 = vsel %vm1048_vm15, %v1046_v11, %v1050_v14  ;;  %v1047_v15 = vadd.f32 %v1044_v13, %v984_v8 }
 0x380   : > { %1054 = vst [vmem:[%s305_s22] sm:$0xff] %v1052_v30 }
 0x381   : > { %vm1049_vm1 = vcmp.gt.f32.partialorder %v1047_v15, 0.0  ;;  %v1051_v16 = vmul.f32 0.2, %v1047_v15 }
 0x383   : > { %v1053_v17 = vsel %vm1049_vm1, %v1047_v15, %v1051_v16 }
 0x384   : > { %1055 = vst [vmem:[%s305_s22 + $0x8] sm:$0xff] %v1053_v17 }
 0x385 PF: > { %s18_s27 = sadd.s32 1, %s1236_s27  }
 0x386   : > { %p15_p4 = scmp.ge.s32.totalorder %s18_s27, 4  }
 0x388   :  { %17 = sbr.rel (!%p15_p4) target bundleno = 1 (0x1), region = 94 }

</bundles_post_ra>
